<compile_context>
chip_gen: v5e
topology: v5e:2x2
jax: 0.10.0
libtpu: 0.0.40
codegen_flags: <defaults>
</compile_context>

<pallas_src>
import jax
import jax.numpy as jnp
from jax.experimental import pallas as pl
from jax.experimental.pallas import tpu as pltpu

NIN = 38 + 38 + 1 + 19 + 1 + 38 + 1   # = 136
H1 = 128
H2 = 64
H2_PAD = 128                          # hidden padded to lane width
PHYSICS_LS = 128
TB_MAX = 2048                         # max batch-tile size (rows per grid step)


def _input_net_kernel(x_ref, mean_ref, inv_std_ref, w1_ref, b1_ref,
                      w2_ref, b2_ref, w3_ref, b3_ref,
                      beta1_ref, beta2_ref, o_ref):
    # Normalization in f32 (preserves precision of raw features), then cast to
    # bf16 only for the MXU operand.
    xn = (x_ref[...] - mean_ref[...]) * inv_std_ref[...]            # (TB, NIN) f32

    h1 = jnp.dot(xn.astype(jnp.bfloat16), w1_ref[...],
                 preferred_element_type=jnp.float32) + b1_ref[...]
    h1 = h1 * jax.nn.sigmoid(beta1_ref[0, 0] * h1)                  # swish, f32

    # Layer 2 (hidden padded 64 -> 128 with zero columns; swish(0) = 0).
    h2 = jnp.dot(h1.astype(jnp.bfloat16), w2_ref[...],
                 preferred_element_type=jnp.float32) + b2_ref[...]
    h2 = h2 * jax.nn.sigmoid(beta2_ref[0, 0] * h2)

    # Layer 3 + tanh (zero rows of w3 cancel the padded hidden columns).
    h3 = jnp.dot(h2.astype(jnp.bfloat16), w3_ref[...],
                 preferred_element_type=jnp.float32) + b3_ref[...]
    o_ref[...] = jnp.tanh(h3).astype(o_ref.dtype)


def _round_up(n, m):
    return (n + m - 1) // m * m


def _choose_tb(b):
    """Batch tile: multiple of 8, <= TB_MAX, <= array rows, split ~evenly,
    and >= 2-4 grid steps once the batch is large (pipelining / v7x 2 TCs)."""
    if b <= 8:
        return 8
    min_steps = min(4, b // 512)
    n_steps = max(pl.cdiv(b, TB_MAX), min_steps, 1)
    tb = _round_up(pl.cdiv(b, n_steps), 8)
    return min(tb, (b // 8) * 8)


def _prepare_params(params):
    """Pad hidden 64->128 (zeros; numerically identical since swish(0)=0),
    bf16 matmul operands, f32 biases / mean / 1/std."""
    w2 = jnp.zeros((H1, H2_PAD), jnp.float32).at[:, :H2].set(params["w2"])
    b2 = jnp.zeros((1, H2_PAD), jnp.float32).at[:, :H2].set(params["b2"])
    w3 = jnp.zeros((H2_PAD, PHYSICS_LS), jnp.float32).at[:H2, :].set(params["w3"])
    return dict(
        mean=params["mean"].astype(jnp.float32),
        inv_std=(1.0 / params["std"]).astype(jnp.float32),
        w1=params["w1"].astype(jnp.bfloat16), b1=params["b1"].astype(jnp.float32),
        w2=w2.astype(jnp.bfloat16), b2=b2,
        w3=w3.astype(jnp.bfloat16), b3=params["b3"].astype(jnp.float32),
        beta1=params["beta1"].astype(jnp.float32),
        beta2=params["beta2"].astype(jnp.float32),
    )


def input_net_forward(x, params, *, out_dtype=jnp.bfloat16):
    """x: (B, NIN) float32. params: raw InputNet parameters (see init_params).

    Returns (B, PHYSICS_LS) in `out_dtype` (bf16 default; pass jnp.float32 if
    the consumer strictly needs f32)."""
    B = x.shape[0]
    assert x.shape[1] == NIN, f"x.shape[1] = {x.shape[1]}, NIN = {NIN}"

    x = x.astype(jnp.float32)
    p = _prepare_params(params)

    # Only sub-sublane batches get padded; otherwise the ragged tail is handled
    # by the grid's partial last block (OOB writes dropped, rows independent).
    if B < 8:
        x_in = jnp.pad(x, ((0, 8 - B), (0, 0)))
        Bp = 8
    else:
        x_in = x
        Bp = B

    TB = _choose_tb(Bp)
    grid = (pl.cdiv(Bp, TB),)

    const = lambda shape: pl.BlockSpec(shape, lambda i: (0,) * len(shape))
    smem = pl.BlockSpec(memory_space=pltpu.MemorySpace.SMEM)

    out_bytes = jnp.dtype(out_dtype).itemsize
    weight_elems = NIN * H1 + H1 * H2_PAD + H2_PAD * PHYSICS_LS
    cost = pl.CostEstimate(
        flops=2 * Bp * weight_elems,
        transcendentals=3 * Bp * PHYSICS_LS,
        bytes_accessed=Bp * (NIN * 4 + PHYSICS_LS * out_bytes)
        + 2 * weight_elems
        + 4 * (2 * NIN + H1 + H2_PAD + PHYSICS_LS + 2),
    )

    out = pl.pallas_call(
        _input_net_kernel,
        out_shape=jax.ShapeDtypeStruct((Bp, PHYSICS_LS), out_dtype),
        grid=grid,
        in_specs=[
            pl.BlockSpec((TB, NIN), lambda i: (i, 0)),             # x (streamed f32)
            const((1, NIN)), const((1, NIN)),                      # mean, 1/std
            const((NIN, H1)), const((1, H1)),                      # w1, b1 (resident)
            const((H1, H2_PAD)), const((1, H2_PAD)),               # w2, b2
            const((H2_PAD, PHYSICS_LS)), const((1, PHYSICS_LS)),   # w3, b3
            smem, smem,                                            # beta1, beta2
        ],
        out_specs=pl.BlockSpec((TB, PHYSICS_LS), lambda i: (i, 0)),
        compiler_params=pltpu.CompilerParams(
            dimension_semantics=("parallel",),
            vmem_limit_bytes=32 * 1024 * 1024),
        cost_estimate=cost,
    )(x_in, p["mean"], p["inv_std"], p["w1"], p["b1"], p["w2"], p["b2"],
      p["w3"], p["b3"], p["beta1"], p["beta2"])

    return out[:B] if Bp != B else out


def init_params(key):
    """Deterministic synthetic parameters (matching PyTorch layer shapes)."""
    ks = jax.random.split(key, 8)

    def linear(kw, kb, fan_in, fan_out):
        bound = 1.0 / jnp.sqrt(fan_in)
        w = jax.random.uniform(kw, (fan_in, fan_out), jnp.float32, -bound, bound)
        b = jax.random.uniform(kb, (1, fan_out), jnp.float32, -bound, bound)
        return w, b

    w1, b1 = linear(ks[0], ks[1], NIN, H1)
    w2, b2 = linear(ks[2], ks[3], H1, H2)
    w3, b3 = linear(ks[4], ks[5], H2, PHYSICS_LS)

    # Non-trivial mean/std (valid x_mean_std constructor arg) to exercise the
    # in-kernel normalization.
    mean = 0.1 * jax.random.normal(ks[6], (1, NIN), jnp.float32)
    std = 0.5 + jax.random.uniform(ks[7], (1, NIN), jnp.float32, 0.0, 1.0)

    return {
        "mean": mean, "std": std,
        "w1": w1, "b1": b1, "beta1": jnp.ones((1, 1), jnp.float32),
        "w2": w2, "b2": b2, "beta2": jnp.ones((1, 1), jnp.float32),
        "w3": w3, "b3": b3,
    }


def _reference(x, p):
    """Pure-JAX f32 reference of InputNet.forward (original PyTorch semantics)."""
    xn = (x - p["mean"]) / p["std"]
    h1 = xn @ p["w1"] + p["b1"]
    h1 = h1 * jax.nn.sigmoid(p["beta1"][0, 0] * h1)
    h2 = h1 @ p["w2"] + p["b2"]
    h2 = h2 * jax.nn.sigmoid(p["beta2"][0, 0] * h2)
    return jnp.tanh(h2 @ p["w3"] + p["b3"])


if __name__ == "__main__":
    key = jax.random.PRNGKey(0)
    k_x1, k_x2, k_p = jax.random.split(key, 3)
    params = init_params(k_p)

    # B=6: tiny, non-multiple-of-8 batch (padded-to-8 path, single grid step).
    # B=20: exercises the ragged-tail path (TB=16, 2 grid steps, partial block).
    for B, kx in ((6, k_x1), (20, k_x2)):
        x = jax.random.normal(kx, (B, NIN), jnp.float32)
        out = jax.block_until_ready(input_net_forward(x, params))
        ref = _reference(x, params)
        assert out.shape == (B, PHYSICS_LS)
        # bf16 weights/activations-in + bf16 output with f32 accumulation.
        assert jnp.allclose(out.astype(jnp.float32), ref, atol=2e-2, rtol=2e-2), \
            f"mismatch vs reference for B={B}"

    print("KERNEL_OK")
</pallas_src>

<mosaic_0001>
module attributes {stable_mosaic.version = 11 : i64} {
  func.func @_input_net_kernel(%arg0: i32, %arg1: memref<8x136xf32, #tpu.memory_space<vmem>>, %arg2: memref<1x136xf32, #tpu.memory_space<vmem>>, %arg3: memref<1x136xf32, #tpu.memory_space<vmem>>, %arg4: memref<136x128xbf16, #tpu.memory_space<vmem>>, %arg5: memref<1x128xf32, #tpu.memory_space<vmem>>, %arg6: memref<128x128xbf16, #tpu.memory_space<vmem>>, %arg7: memref<1x128xf32, #tpu.memory_space<vmem>>, %arg8: memref<128x128xbf16, #tpu.memory_space<vmem>>, %arg9: memref<1x128xf32, #tpu.memory_space<vmem>>, %arg10: memref<1x1xf32, #tpu.memory_space<smem>>, %arg11: memref<1x1xf32, #tpu.memory_space<smem>>, %arg12: memref<8x128xbf16, #tpu.memory_space<vmem>>) attributes {dimension_semantics = [#tpu.dimension_semantics<parallel>], iteration_bounds = array<i64: 1>, scalar_prefetch = 0 : i64, scratch_operands = 0 : i64, tpu.core_type = #tpu.core_type<tc>, window_params = [{transform_indices = @transform_0, window_bounds = array<i64: 8, 136>}, {pipeline_mode = #tpu.pipeline_mode<synchronous>, transform_indices = @transform_1, window_bounds = array<i64: 1, 136>}, {pipeline_mode = #tpu.pipeline_mode<synchronous>, transform_indices = @transform_2, window_bounds = array<i64: 1, 136>}, {pipeline_mode = #tpu.pipeline_mode<synchronous>, transform_indices = @transform_3, window_bounds = array<i64: 136, 128>}, {pipeline_mode = #tpu.pipeline_mode<synchronous>, transform_indices = @transform_4, window_bounds = array<i64: 1, 128>}, {pipeline_mode = #tpu.pipeline_mode<synchronous>, transform_indices = @transform_5, window_bounds = array<i64: 128, 128>}, {pipeline_mode = #tpu.pipeline_mode<synchronous>, transform_indices = @transform_6, window_bounds = array<i64: 1, 128>}, {pipeline_mode = #tpu.pipeline_mode<synchronous>, transform_indices = @transform_7, window_bounds = array<i64: 128, 128>}, {pipeline_mode = #tpu.pipeline_mode<synchronous>, transform_indices = @transform_8, window_bounds = array<i64: 1, 128>}, {transform_indices = @transform_9, window_bounds = array<i64: 1, 1>}, {transform_indices = @transform_10, window_bounds = array<i64: 1, 1>}, {transform_indices = @transform_11, window_bounds = array<i64: 8, 128>}]} {
    %c0 = arith.constant 0 : index
    %c0_0 = arith.constant 0 : index
    %0 = vector.load %arg1[%c0, %c0_0] : memref<8x136xf32, #tpu.memory_space<vmem>>, vector<8x136xf32>
    %c0_1 = arith.constant 0 : index
    %c0_2 = arith.constant 0 : index
    %1 = vector.load %arg2[%c0_1, %c0_2] : memref<1x136xf32, #tpu.memory_space<vmem>>, vector<1x136xf32>
    %2 = vector.broadcast %1 : vector<1x136xf32> to vector<8x136xf32>
    %3 = arith.subf %0, %2 : vector<8x136xf32>
    %c0_3 = arith.constant 0 : index
    %c0_4 = arith.constant 0 : index
    %4 = vector.load %arg3[%c0_3, %c0_4] : memref<1x136xf32, #tpu.memory_space<vmem>>, vector<1x136xf32>
    %5 = vector.broadcast %4 : vector<1x136xf32> to vector<8x136xf32>
    %6 = arith.mulf %3, %5 : vector<8x136xf32>
    %7 = arith.truncf %6 : vector<8x136xf32> to vector<8x136xbf16>
    %c0_5 = arith.constant 0 : index
    %c0_6 = arith.constant 0 : index
    %8 = vector.load %arg4[%c0_5, %c0_6] : memref<136x128xbf16, #tpu.memory_space<vmem>>, vector<136x128xbf16>
    %cst = arith.constant dense<0.000000e+00> : vector<8x128xf32>
    %9 = tpu.matmul %7, %8, %cst {dimension_numbers = #tpu.dot_dimension_numbers<[1], [0], [0], [1], [0, 0, 1, 1], [], []>} : vector<8x136xbf16>, vector<136x128xbf16>, vector<8x128xf32> -> vector<8x128xf32>
    %c0_7 = arith.constant 0 : index
    %c0_8 = arith.constant 0 : index
    %10 = vector.load %arg5[%c0_7, %c0_8] : memref<1x128xf32, #tpu.memory_space<vmem>>, vector<1x128xf32>
    %11 = vector.broadcast %10 : vector<1x128xf32> to vector<8x128xf32>
    %12 = arith.addf %9, %11 : vector<8x128xf32>
    %c0_9 = arith.constant 0 : index
    %c0_10 = arith.constant 0 : index
    %13 = memref.load %arg10[%c0_9, %c0_10] : memref<1x1xf32, #tpu.memory_space<smem>>
    %14 = vector.broadcast %13 : f32 to vector<8x128xf32>
    %15 = arith.mulf %14, %12 : vector<8x128xf32>
    %16 = arith.negf %15 : vector<8x128xf32>
    %17 = math.exp %16 : vector<8x128xf32>
    %cst_11 = arith.constant 1.000000e+00 : f32
    %18 = vector.broadcast %cst_11 : f32 to vector<8x128xf32>
    %19 = arith.addf %18, %17 : vector<8x128xf32>
    %20 = arith.divf %18, %19 : vector<8x128xf32>
    %21 = arith.mulf %12, %20 : vector<8x128xf32>
    %22 = arith.truncf %21 : vector<8x128xf32> to vector<8x128xbf16>
    %c0_12 = arith.constant 0 : index
    %c0_13 = arith.constant 0 : index
    %23 = vector.load %arg6[%c0_12, %c0_13] : memref<128x128xbf16, #tpu.memory_space<vmem>>, vector<128x128xbf16>
    %cst_14 = arith.constant dense<0.000000e+00> : vector<8x128xf32>
    %24 = tpu.matmul %22, %23, %cst_14 {dimension_numbers = #tpu.dot_dimension_numbers<[1], [0], [0], [1], [0, 0, 1, 1], [], []>} : vector<8x128xbf16>, vector<128x128xbf16>, vector<8x128xf32> -> vector<8x128xf32>
    %c0_15 = arith.constant 0 : index
    %c0_16 = arith.constant 0 : index
    %25 = vector.load %arg7[%c0_15, %c0_16] : memref<1x128xf32, #tpu.memory_space<vmem>>, vector<1x128xf32>
    %26 = vector.broadcast %25 : vector<1x128xf32> to vector<8x128xf32>
    %27 = arith.addf %24, %26 : vector<8x128xf32>
    %c0_17 = arith.constant 0 : index
    %c0_18 = arith.constant 0 : index
    %28 = memref.load %arg11[%c0_17, %c0_18] : memref<1x1xf32, #tpu.memory_space<smem>>
    %29 = vector.broadcast %28 : f32 to vector<8x128xf32>
    %30 = arith.mulf %29, %27 : vector<8x128xf32>
    %31 = arith.negf %30 : vector<8x128xf32>
    %32 = math.exp %31 : vector<8x128xf32>
    %cst_19 = arith.constant 1.000000e+00 : f32
    %33 = vector.broadcast %cst_19 : f32 to vector<8x128xf32>
    %34 = arith.addf %33, %32 : vector<8x128xf32>
    %35 = arith.divf %33, %34 : vector<8x128xf32>
    %36 = arith.mulf %27, %35 : vector<8x128xf32>
    %37 = arith.truncf %36 : vector<8x128xf32> to vector<8x128xbf16>
    %c0_20 = arith.constant 0 : index
    %c0_21 = arith.constant 0 : index
    %38 = vector.load %arg8[%c0_20, %c0_21] : memref<128x128xbf16, #tpu.memory_space<vmem>>, vector<128x128xbf16>
    %cst_22 = arith.constant dense<0.000000e+00> : vector<8x128xf32>
    %39 = tpu.matmul %37, %38, %cst_22 {dimension_numbers = #tpu.dot_dimension_numbers<[1], [0], [0], [1], [0, 0, 1, 1], [], []>} : vector<8x128xbf16>, vector<128x128xbf16>, vector<8x128xf32> -> vector<8x128xf32>
    %c0_23 = arith.constant 0 : index
    %c0_24 = arith.constant 0 : index
    %40 = vector.load %arg9[%c0_23, %c0_24] : memref<1x128xf32, #tpu.memory_space<vmem>>, vector<1x128xf32>
    %41 = vector.broadcast %40 : vector<1x128xf32> to vector<8x128xf32>
    %42 = arith.addf %39, %41 : vector<8x128xf32>
    %43 = math.tanh %42 : vector<8x128xf32>
    %44 = arith.truncf %43 : vector<8x128xf32> to vector<8x128xbf16>
    %c0_25 = arith.constant 0 : index
    %c0_26 = arith.constant 0 : index
    %45 = vector.load %arg12[%c0_25, %c0_26] : memref<8x128xbf16, #tpu.memory_space<vmem>>, vector<8x128xbf16>
    tpu.vector_store %arg12[%c0_25, %c0_26], %44 {strides = array<i32>} : memref<8x128xbf16, #tpu.memory_space<vmem>>, vector<8x128xbf16>,
    return
  }
  func.func @transform_0(%arg0: i32) -> (i32, i32) {
    %c0_i32 = arith.constant 0 : i32
    %c0_i32_0 = arith.constant 0 : i32
    return %arg0, %c0_i32 : i32, i32
  }
  func.func @transform_1(%arg0: i32) -> (i32, i32) {
    %c0_i32 = arith.constant 0 : i32
    %c0_i32_0 = arith.constant 0 : i32
    %c0_i32_1 = arith.constant 0 : i32
    return %c0_i32, %c0_i32_0 : i32, i32
  }
  func.func @transform_2(%arg0: i32) -> (i32, i32) {
    %c0_i32 = arith.constant 0 : i32
    %c0_i32_0 = arith.constant 0 : i32
    %c0_i32_1 = arith.constant 0 : i32
    return %c0_i32, %c0_i32_0 : i32, i32
  }
  func.func @transform_3(%arg0: i32) -> (i32, i32) {
    %c0_i32 = arith.constant 0 : i32
    %c0_i32_0 = arith.constant 0 : i32
    %c0_i32_1 = arith.constant 0 : i32
    return %c0_i32, %c0_i32_0 : i32, i32
  }
  func.func @transform_4(%arg0: i32) -> (i32, i32) {
    %c0_i32 = arith.constant 0 : i32
    %c0_i32_0 = arith.constant 0 : i32
    %c0_i32_1 = arith.constant 0 : i32
    return %c0_i32, %c0_i32_0 : i32, i32
  }
  func.func @transform_5(%arg0: i32) -> (i32, i32) {
    %c0_i32 = arith.constant 0 : i32
    %c0_i32_0 = arith.constant 0 : i32
    %c0_i32_1 = arith.constant 0 : i32
    return %c0_i32, %c0_i32_0 : i32, i32
  }
  func.func @transform_6(%arg0: i32) -> (i32, i32) {
    %c0_i32 = arith.constant 0 : i32
    %c0_i32_0 = arith.constant 0 : i32
    %c0_i32_1 = arith.constant 0 : i32
    return %c0_i32, %c0_i32_0 : i32, i32
  }
  func.func @transform_7(%arg0: i32) -> (i32, i32) {
    %c0_i32 = arith.constant 0 : i32
    %c0_i32_0 = arith.constant 0 : i32
    %c0_i32_1 = arith.constant 0 : i32
    return %c0_i32, %c0_i32_0 : i32, i32
  }
  func.func @transform_8(%arg0: i32) -> (i32, i32) {
    %c0_i32 = arith.constant 0 : i32
    %c0_i32_0 = arith.constant 0 : i32
    %c0_i32_1 = arith.constant 0 : i32
    return %c0_i32, %c0_i32_0 : i32, i32
  }
  func.func @transform_9(%arg0: i32) -> (i32, i32) {
    %c0_i32 = arith.constant 0 : i32
    %c0_i32_0 = arith.constant 0 : i32
    %c0_i32_1 = arith.constant 0 : i32
    return %c0_i32, %c0_i32_0 : i32, i32
  }
  func.func @transform_10(%arg0: i32) -> (i32, i32) {
    %c0_i32 = arith.constant 0 : i32
    %c0_i32_0 = arith.constant 0 : i32
    %c0_i32_1 = arith.constant 0 : i32
    return %c0_i32, %c0_i32_0 : i32, i32
  }
  func.func @transform_11(%arg0: i32) -> (i32, i32) {
    %c0_i32 = arith.constant 0 : i32
    %c0_i32_0 = arith.constant 0 : i32
    return %arg0, %c0_i32 : i32, i32
  }
}

</mosaic_0001>

<bundles_post_ra>
// kernel: tpu_custom_call.1
= control target key start
LH: loop header
LB: loop body
LE: loop exit
PB: predicated region body
PF: predicated region fallthrough
CT: control target
= control target key end

     0   :  { %18 = vsyncpa [#allocation5], 0  ;;  %s835_s0 = inlined_call_operand.hbm [shape: f32[8,136], index: 0, kind: input, shape index: {}]   ;;  %s836_s1 = inlined_call_operand.vmem [shape: f32[1,136], index: 1, kind: input, shape index: {}]   ;;  %s837_s2 = inlined_call_operand.vmem [shape: f32[1,136], index: 2, kind: input, shape index: {}]   ;;  %s838_s3 = inlined_call_operand.hbm [shape: bf16[136,128], index: 3, kind: input, shape index: {}]   ;;  %s839_s4 = inlined_call_operand.vmem [shape: f32[1,128], index: 4, kind: input, shape index: {}]   ;;  %s840_s5 = inlined_call_operand.hbm [shape: bf16[128,128], index: 5, kind: input, shape index: {}]   ;;  %s841_s6 = inlined_call_operand.vmem [shape: f32[1,128], index: 6, kind: input, shape index: {}]   ;;  %s842_s7 = inlined_call_operand.hbm [shape: bf16[128,128], index: 7, kind: input, shape index: {}]   ;;  %s843_s8 = inlined_call_operand.vmem [shape: f32[1,128], index: 8, kind: input, shape index: {}]   ;;  %s844_s9 = inlined_call_operand.<no memory space> [shape: f32[1,1], index: 9, kind: input, shape index: {}]   ;;  %s845_s10 = inlined_call_operand.<no memory space> [shape: f32[1,1], index: 10, kind: input, shape index: {}]   ;;  %s846_s11 = inlined_call_operand.hbm [shape: bf16[8,128], index: 11, kind: output, shape index: {}]  }
   0x1   :  { %19 = vsyncpa [#allocation8], 0 }
   0x2   :  { %20 = vsyncpa [#allocation11], 0  ;;  %s41_s19 = sshll.u32 %s838_s3, 4  ;;  %s42_s19 = int_to_ptr.hbm [resolvable:$true] %s41_s19 }
   0x3   :  { %21 = vsyncpa [#allocation6], 0  ;;  %s732_s20 = smov [#allocation7]   ;;  %s27_s24 = sshll.u32 %s835_s0, 4  ;;  %s28_s24 = int_to_ptr.hbm [resolvable:$true] %s27_s24 }
   0x4   :  { %s43_s21 = sshll.u32 %s732_s20, 4  ;;  %s733_s25 = smov 64   ;;  %s44_s21 = int_to_ptr.vmem [resolvable:$true] %s43_s21 }
   0x5   :  { %s734_s26 = smov 4   ;;  %s735_s27 = smov [#allocation4]  }
   0x6   :  { %49 = dma.hbm_to_vmem [thread:$0]  %s42_s19, 1088, %s44_s21, [#allocation8], %s733_s25, %s733_s25, %s734_s26  }
   0x7   :  { %s29_s28 = sshll.u32 %s735_s27, 4  ;;  %s56_s12 = sshll.u32 %s840_s5, 4  ;;  %s30_s28 = int_to_ptr.vmem [resolvable:$true] %s29_s28  ;;  %s57_s12 = int_to_ptr.hbm [resolvable:$true] %s56_s12 }
   0x8   :  { %32 = dma.hbm_to_vmem [thread:$0]  %s28_s24, 256, %s30_s28, [#allocation5]  }
   0x9   :  { %s71_s14 = sshll.u32 %s842_s7, 4  ;;  %s736_s15 = smov [#allocation9]   ;;  %s72_s14 = int_to_ptr.hbm [resolvable:$true] %s71_s14 }
   0xa   :  { %s58_s16 = sshll.u32 %s736_s15, 4  ;;  %s737_s0 = smov [#allocation10]   ;;  %s59_s16 = int_to_ptr.vmem [resolvable:$true] %s58_s16 }
   0xb   :  { %64 = dma.hbm_to_vmem [thread:$0]  %s57_s12, 1024, %s59_s16, [#allocation8], %s733_s25, %s733_s25, %s734_s26  }
   0xc   :  { %s73_s17 = sshll.u32 %s737_s0, 4  ;;  %s74_s17 = int_to_ptr.vmem [resolvable:$true] %s73_s17 }
   0xd   :  { %79 = dma.hbm_to_vmem [thread:$0]  %s72_s14, 1024, %s74_s17, [#allocation11], %s733_s25, %s733_s25, %s734_s26  }
   0xe   :  { %724 = dma.done.wait [#allocation5], 256  }
   0xf   :  { %725 = vsyncadd [#allocation5], 4294967040 }
  0x10   :  { %726 = dma.done.wait [#allocation8], 2112  }
  0x11   :  { %727 = vsyncadd [#allocation8], 4294965184 }
  0x12   :  { %728 = dma.done.wait [#allocation11], 1024  }
  0x13   :  { %729 = vsyncadd [#allocation11], 4294966272  ;;  %v567_v0 = vld [vmem:[#allocation7 + $0x38] sm:$0xff]  ;;  %v566_v1 = vld [vmem:[#allocation7 + $0x30] sm:$0xff]  ;;  %vm199_vm0 = vcmask 1043456   ;;  %vm195_vm1 = vcmask 64512   ;;  %v230_v39 = vstv %s844_s9 }
  0x14   :  { %203 = vmatpush.bf16.msra.mxu0 %v567_v0  ;;  %v139_v2 = vld [vmem:[#allocation7 + $0x40] sm:$0xf]  ;;  %v104_v4 = vld [vmem:[#allocation4 + $0x8] sm:$0xff]  ;;  %v105_v5 = vld [vmem:[%s836_s1] sm:$0x3]  ;;  %s738_s24 = smov [#allocation12]  }
  0x15   :  { %v177_v3 = vunpack.c.l.b16 %v139_v2  ;;  %v113_v6 = vld [vmem:[%s837_s2] sm:$0x3]  ;;  %v108_v7 = vperm.slane %v105_v5, 1  ;;  %v565_v10 = vld [vmem:[#allocation7 + $0x28] sm:$0xff]  ;;  %v564_v14 = vld [vmem:[#allocation7 + $0x20] sm:$0xff]  ;;  %v107_v17 = vperm.slane %v105_v5, 0 }
  0x16   :  { %v116_v8 = vperm.slane %v113_v6, 1  ;;  %v563_v16 = vld [vmem:[#allocation7 + $0x18] sm:$0xff]  ;;  %v562_v18 = vld [vmem:[#allocation7 + $0x10] sm:$0xff]  ;;  %v115_v21 = vperm.slane %v113_v6, 0  ;;  %v561_v22 = vld [vmem:[#allocation7 + $0x8] sm:$0xff]  ;;  %s447_s25 = sshll.u32 %s738_s24, 4  ;;  %s448_s25 = int_to_ptr.vmem [resolvable:$true] %s447_s25 }
  0x17   :  { %v186_v9 = vpack.c.b16 %v177_v3, %v177_v3  ;;  %v112_v11 = vsub.f32 %v104_v4, %v108_v7  ;;  %v103_v19 = vld [vmem:[#allocation4] sm:$0xff]  ;;  %v560_v24 = vld [vmem:[#allocation7] sm:$0xff]  ;;  %v335_v4 = vstv %s845_s10  ;;  %s449_s28 = sshll.u32 %s846_s11, 4  ;;  %s450_s28 = int_to_ptr.hbm [resolvable:$true] %s449_s28 }
  0x18   :  { %204 = vmatpush.bf16.msra.mxu0 %v566_v1  ;;  %v111_v20 = vsub.f32 %v103_v19, %v107_v17  ;;  %v575_v26 = vld [vmem:[#allocation9 + $0x38] sm:$0xff]  ;;  %v574_v27 = vld [vmem:[#allocation9 + $0x30] sm:$0xff]  ;;  %v573_v29 = vld [vmem:[#allocation9 + $0x28] sm:$0xff] }
  0x19   :  { %v201_v12 = vsel %vm199_vm0, %v186_v9, 0  ;;  %v120_v13 = vmul.f32 %v116_v8, %v112_v11  ;;  %321 = vmatpush.bf16.msra.mxu2 %v575_v26  ;;  %v572_v30 = vld [vmem:[#allocation9 + $0x20] sm:$0xff]  ;;  %v571_v32 = vld [vmem:[#allocation9 + $0x18] sm:$0xff]  ;;  %v570_v33 = vld [vmem:[#allocation9 + $0x10] sm:$0xff] }
  0x1a   :  { %223 = vmatpush.bf16.msra.mxu1 %v201_v12  ;;  %v119_v23 = vmul.f32 %v115_v21, %v111_v20  ;;  %v569_v34 = vld [vmem:[#allocation9 + $0x8] sm:$0xff]  ;;  %v568_v37 = vld [vmem:[#allocation9] sm:$0xff]  ;;  %v583_v58 = vld [vmem:[#allocation10 + $0x38] sm:$0xff] }
  0x1b   :  { %v122_v15 = vpack.c.bf16 %v120_v13, %v120_v13  ;;  %v591_v35 = vld [vmem:[%s839_s4] ss:$0 sm:$0xff]  ;;  %426 = vmatpush.bf16.msra.mxu3 %v583_v58  ;;  %v582_v59 = vld [vmem:[#allocation10 + $0x30] sm:$0xff]  ;;  %v580_v61 = vld [vmem:[#allocation10 + $0x20] sm:$0xff] }
  0x1c   :  { %205 = vmatpush.bf16.msra.mxu0 %v565_v10  ;;  %v121_v25 = vpack.c.bf16 %v119_v23, %v119_v23  ;;  %v581_v60 = vld [vmem:[#allocation10 + $0x28] sm:$0xff]  ;;  %v579_v62 = vld [vmem:[#allocation10 + $0x18] sm:$0xff]  ;;  %v578_v63 = vld [vmem:[#allocation10 + $0x10] sm:$0xff] }
  0x1d   :  { %493 = vmatmul.msk.bf16.vlgmr.msra.gmra.mxu1 %vm195_vm1, %v122_v15  ;;  %322 = vmatpush.bf16.msra.mxu2 %v574_v27  ;;  %v577_v0 = vld [vmem:[#allocation10 + $0x8] sm:$0xff]  ;;  %v576_v2 = vld [vmem:[#allocation10] sm:$0xff] }
  0x1e   :  { %v592_v1 = vld [vmem:[%s841_s6] ss:$0 sm:$0xff] }
  0x1f   :  { %427 = vmatpush.bf16.msra.mxu3 %v582_v59  ;;  %v593_v23 = vld [vmem:[%s843_s8] ss:$0 sm:$0xff] }
  0x20   :  { %206 = vmatpush.bf16.msra.mxu0 %v564_v14 }
  0x21   :  { %323 = vmatpush.bf16.msra.mxu2 %v573_v29 }
  0x23   :  { %428 = vmatpush.bf16.msra.mxu3 %v581_v60 }
  0x24   :  { %207 = vmatpush.bf16.msra.mxu0 %v563_v16 }
  0x25   :  { %324 = vmatpush.bf16.msra.mxu2 %v572_v30 }
  0x27   :  { %429 = vmatpush.bf16.msra.mxu3 %v580_v61 }
  0x28   :  { %208 = vmatpush.bf16.msra.mxu0 %v562_v18 }
  0x29   :  { %325 = vmatpush.bf16.msra.mxu2 %v571_v32 }
  0x2b   :  { %430 = vmatpush.bf16.msra.mxu3 %v579_v62 }
  0x2c   :  { %209 = vmatpush.bf16.msra.mxu0 %v561_v22 }
  0x2d   :  { %326 = vmatpush.bf16.msra.mxu2 %v570_v33 }
  0x2f   :  { %431 = vmatpush.bf16.msra.mxu3 %v578_v63 }
  0x30   :  { %210 = vmatpush.bf16.msra.mxu0 %v560_v24 }
  0x31   :  { %327 = vmatpush.bf16.msra.mxu2 %v569_v34 }
  0x33   :  { %211 = vmatmul.bf16.vlgmr.msra.gmra.mxu0 %v121_v25  ;;  %432 = vmatpush.bf16.msra.mxu3 %v577_v0 }
  0x35   :  { %328 = vmatpush.bf16.msra.mxu2 %v568_v37 }
  0x37   :  { %433 = vmatpush.bf16.msra.mxu3 %v576_v2 }
  0x9a   :  { %v225_v28 = vpop.f32.mrf.mxu1 }
  0xa2   :  { %v227_v31 = vpop.f32.mrf.mxu1 }
  0xb0   :  { %v212_v36 = vpop.f32.mrf.mxu0 }
  0xb1   :  { %v213_v38 = vadd.f32 %v591_v35, %v212_v36 }
  0xb3   :  { %v226_v40 = vadd.f32 %v225_v28, %v213_v38 }
  0xb5   :  { %v231_v41 = vmul.f32 %v230_v39, %v226_v40 }
  0xb7   :  { %v494_v42 = vmul.f32 -1.442695, %v231_v41 }
  0xb8   :  { %v214_v43 = vpop.f32.mrf.mxu0 }
  0xb9   :  { %594 = vpow2.f32 %v494_v42 }
  0xbf   :  { %v595_v44 = vpop.eup %594 }
  0xc0   :  { %v235_v45 = vadd.f32 1.0, %v595_v44 }
  0xc2   :  { %596 = vrcp.f32 %v235_v45  ;;  %v247_v49 = vand.u32 2147483648, %v235_v45  ;;  %v245_v51 = vand.u32 2147483647, %v235_v45  ;;  %vm241_vm3 = vweird.f32 %v235_v45 }
  0xc4   :  { %v248_v53 = vor.u32 1.1754944e-38, %v247_v49  ;;  %vm246_vm5 = vcmp.eq.f32.partialorder %v245_v51, 8.507059e+37 }
  0xc8   :  { %v597_v46 = vpop.eup %596 }
  0xc9   :  { %v237_v47 = vmul.f32 %v597_v46, %v235_v45  ;;  %vm242_vm2 = vweird.f32 %v597_v46 }
  0xca   :  { %vm243_vm4 = vmor %vm241_vm3, %vm242_vm2 }
  0xcb   :  { %v238_v48 = vsub.f32 1.0, %v237_v47 }
  0xcd   :  { %v239_v50 = vmul.f32 %v597_v46, %v238_v48 }
  0xcf   :  { %v240_v52 = vadd.f32 %v597_v46, %v239_v50 }
  0xd1   :  { %v244_v54 = vsel %vm243_vm4, %v597_v46, %v240_v52 }
  0xd2   :  { %v249_v55 = vsel %vm246_vm5, %v248_v53, %v244_v54 }
  0xd3   :  { %v251_v56 = vmul.f32 %v249_v55, %v226_v40 }
  0xd5   :  { %v252_v57 = vpack.c.bf16 %v251_v56, %v251_v56 }
  0xd7   :  { %329 = vmatmul.bf16.vlgmr.msra.gmra.mxu2 %v252_v57 }
 0x15a   :  { %v330_v3 = vpop.f32.mrf.mxu2 }
 0x15b   :  { %v331_v5 = vadd.f32 %v592_v1, %v330_v3 }
 0x15d   :  { %v336_v6 = vmul.f32 %v335_v4, %v331_v5 }
 0x15f   :  { %v527_v7 = vmul.f32 -1.442695, %v336_v6 }
 0x161   :  { %598 = vpow2.f32 %v527_v7 }
 0x162   :  { %v332_v8 = vpop.f32.mrf.mxu2 }
 0x167   :  { %v599_v9 = vpop.eup %598 }
 0x168   :  { %v340_v10 = vadd.f32 1.0, %v599_v9 }
 0x16a   :  { %600 = vrcp.f32 %v340_v10  ;;  %v352_v14 = vand.u32 2147483648, %v340_v10  ;;  %v350_v16 = vand.u32 2147483647, %v340_v10  ;;  %vm346_vm7 = vweird.f32 %v340_v10 }
 0x16c   :  { %v353_v18 = vor.u32 1.1754944e-38, %v352_v14  ;;  %vm351_vm9 = vcmp.eq.f32.partialorder %v350_v16, 8.507059e+37 }
 0x170   :  { %v601_v11 = vpop.eup %600 }
 0x171   :  { %v342_v12 = vmul.f32 %v601_v11, %v340_v10  ;;  %vm347_vm6 = vweird.f32 %v601_v11 }
 0x172   :  { %vm348_vm8 = vmor %vm346_vm7, %vm347_vm6 }
 0x173   :  { %v343_v13 = vsub.f32 1.0, %v342_v12 }
 0x175   :  { %v344_v15 = vmul.f32 %v601_v11, %v343_v13 }
 0x177   :  { %v345_v17 = vadd.f32 %v601_v11, %v344_v15 }
 0x179   :  { %v349_v19 = vsel %vm348_vm8, %v601_v11, %v345_v17 }
 0x17a   :  { %v354_v20 = vsel %vm351_vm9, %v353_v18, %v349_v19 }
 0x17b   :  { %v356_v21 = vmul.f32 %v354_v20, %v331_v5 }
 0x17d   :  { %v357_v22 = vpack.c.bf16 %v356_v21, %v356_v21 }
 0x17f   :  { %434 = vmatmul.bf16.vlgmr.msra.gmra.mxu3 %v357_v22 }
 0x202   :  { %v435_v24 = vpop.f32.mrf.mxu3 }
 0x203   :  { %v436_v25 = vadd.f32 %v593_v23, %v435_v24 }
 0x205   :  { %602 = vtanh.f32 %v436_v25 }
 0x20a   :  { %v437_v26 = vpop.f32.mrf.mxu3 }
 0x20b   :  { %v603_v27 = vpop.eup %602 }
 0x20c   :  { %v440_v28 = vpack.c.bf16 %v603_v27, %v603_v27 }
 0x20e   :  { %441 = vst [vmem:[#allocation12] sm:$0xf] %v440_v28 }
 0x20f   :  { %452 = dma.vmem_to_hbm [thread:$0]  %s448_s25, 64, %s450_s28, [#allocation6]  }
 0x210   :  { %730 = dma.done.wait [#allocation6], 64  }
 0x211   :  { %731 = vsyncadd [#allocation6], 4294967232 }
 0x212   :  { %457 = vsyncpa [#allocation5], 1 }
 0x213   :  { %458 = vsyncpa [#allocation8], 1 }
 0x214   :  { %459 = vsyncpa [#allocation11], 1 }
 0x215   :  { %460 = vsyncpa [#allocation6], 1 }

</bundles_post_ra>
